<compile_context>
chip_gen: v5e
topology: v5e:2x2
jax: 0.10.0
libtpu: 0.0.40
codegen_flags: <defaults>
</compile_context>

<pallas_src>
import jax
import jax.numpy as jnp
from jax.experimental import pallas as pl
from jax.experimental.pallas import tpu as pltpu


def make_dueling_kernel(n_body_layers, out_ch, compute_dtype):
    """Build a kernel for a body of `n_body_layers` Linear+ReLU layers plus the
    fused (value | advantage) head."""
    inv_actions = 1.0 / float(out_ch)

    def kernel(*refs):
        x_ref = refs[0]
        out_ref = refs[-1]

        h = x_ref[...]
        # --- MLP body: Linear + ReLU stack, f32 accumulation on the MXU ---
        for i in range(n_body_layers):
            w_ref = refs[1 + 2 * i]
            b_ref = refs[2 + 2 * i]
            h = jnp.dot(h.astype(compute_dtype), w_ref[...],
                        preferred_element_type=jnp.float32)
            h = jnp.maximum(h + b_ref[...], 0.0)

        # --- fused heads: one matmul with N = 1 + out_ch output lanes ---
        wha_ref = refs[1 + 2 * n_body_layers]
        bha_ref = refs[2 + 2 * n_body_layers]
        y = jnp.dot(h.astype(compute_dtype), wha_ref[...],
                    preferred_element_type=jnp.float32) + bha_ref[...]

        v = y[:, :1]          # value head  [TB, 1]
        a = y[:, 1:]          # advantage   [TB, out_ch]

        # --- dueling combine: V + (A - mean_over_actions(A)) ---
        a_mean = jnp.sum(a, axis=1, keepdims=True) * inv_actions
        out_ref[...] = (v + (a - a_mean)).astype(out_ref.dtype)

    return kernel


def dueling_mlp(x, params, *, batch_tile=512, compute_dtype=jnp.float32):
    """x: [B, in_channels] float32. params: dict of kernel-layout weights.

    batch_tile: rows per grid step (multiple of 8). For scaled-up configs keep
    2*(TB*(in+hidden+out))*dtype_bytes + all weights under the scoped VMEM
    limit — note v7x has 64 MiB physical VMEM vs 128 MiB on v5e/v6e.
    compute_dtype: set to jnp.bfloat16 at production sizes on v6e/v7x for ~2x
    MXU throughput and halved HBM traffic (accumulation stays f32).
    """
    B, in_ch = x.shape
    n_body = 0
    while f"w{n_body + 1}" in params:
        n_body += 1
    out_ch = params["wa"].shape[1]

    # Fuse V (N=1) and A (N=out_ch) heads into one [hidden, 1+out_ch] matmul —
    # both fit the same padded 128-lane MXU result tile, so V becomes free.
    wha = jnp.concatenate([params["wv"], params["wa"]], axis=1)
    bha = jnp.concatenate([params["bv"], params["ba"]], axis=1)

    weights = []
    for i in range(n_body):
        weights.append(params[f"w{i + 1}"].astype(compute_dtype))
        weights.append(params[f"b{i + 1}"].astype(jnp.float32))
    weights.append(wha.astype(compute_dtype))
    weights.append(bha.astype(jnp.float32))

    x_op = x.astype(compute_dtype)

    tb = min(int(batch_tile), B)
    grid = (pl.cdiv(B, tb),)

    def resident_spec(arr):
        # Whole-array block with a constant block index across the batch grid:
        # stays VMEM-resident with no re-DMA per tile. Shape/rank are bound
        # explicitly (fixes the late-bound closure bug of the old version).
        nd = arr.ndim
        return pl.BlockSpec(arr.shape, lambda i, _nd=nd: (0,) * _nd)

    in_specs = [pl.BlockSpec((tb, in_ch), lambda i: (i, 0))]
    in_specs += [resident_spec(w) for w in weights]

    return pl.pallas_call(
        make_dueling_kernel(n_body, out_ch, compute_dtype),
        out_shape=jax.ShapeDtypeStruct((B, out_ch), jnp.float32),
        grid=grid,
        in_specs=in_specs,
        out_specs=pl.BlockSpec((tb, out_ch), lambda i: (i, 0)),
        compiler_params=pltpu.CompilerParams(
            dimension_semantics=("parallel",)),  # v7x: shard batch over 2 TCs
    )(x_op, *weights)


def init_params(key, in_channels, out_channels, n_filters):
    """Deterministic init. Weights stored as [in, out] (pre-transposed for kernel)."""
    dims = [in_channels] + list(n_filters)
    ks = jax.random.split(key, 2 * (len(dims) - 1) + 4)
    params = {}
    ki = 0

    def lin_init(kw, kb, fan_in, fan_out):
        # PyTorch nn.Linear default: U(-1/sqrt(fan_in), 1/sqrt(fan_in))
        bound = 1.0 / jnp.sqrt(jnp.float32(fan_in))
        w = jax.random.uniform(kw, (fan_in, fan_out), jnp.float32, -bound, bound)
        b = jax.random.uniform(kb, (1, fan_out), jnp.float32, -bound, bound)
        return w, b

    for i in range(len(dims) - 1):
        w, b = lin_init(ks[ki], ks[ki + 1], dims[i], dims[i + 1])
        params[f"w{i + 1}"], params[f"b{i + 1}"] = w, b
        ki += 2

    params["wv"], params["bv"] = lin_init(ks[ki], ks[ki + 1], dims[-1], 1)
    ki += 2
    params["wa"], params["ba"] = lin_init(ks[ki], ks[ki + 1], dims[-1], out_channels)
    return params


if __name__ == "__main__":
    key = jax.random.PRNGKey(0)
    k_x, k_p = jax.random.split(key)

    B, in_channels, out_channels = 8, 16, 4
    n_filters = [32, 32]

    x = jax.random.normal(k_x, (B, in_channels), jnp.float32)
    params = init_params(k_p, in_channels, out_channels, n_filters)

    out = dueling_mlp(x, params)
    jax.block_until_ready(out)

    # sanity check against a pure-JAX reference of the same forward
    def ref(x, p):
        s = jnp.maximum(x @ p["w1"] + p["b1"], 0.0)
        s = jnp.maximum(s @ p["w2"] + p["b2"], 0.0)
        a = s @ p["wa"] + p["ba"]
        v = s @ p["wv"] + p["bv"]
        return v + a - a.mean(axis=1, keepdims=True)

    assert out.shape == (B, out_channels)
    assert jnp.allclose(out, ref(x, params), atol=1e-5, rtol=1e-5)

    print("KERNEL_OK")
</pallas_src>

<mosaic_0001>
module attributes {stable_mosaic.version = 11 : i64} {
  func.func @kernel(%arg0: i32, %arg1: memref<8x16xf32, #tpu.memory_space<vmem>>, %arg2: memref<16x32xf32, #tpu.memory_space<vmem>>, %arg3: memref<1x32xf32, #tpu.memory_space<vmem>>, %arg4: memref<32x32xf32, #tpu.memory_space<vmem>>, %arg5: memref<1x32xf32, #tpu.memory_space<vmem>>, %arg6: memref<32x5xf32, #tpu.memory_space<vmem>>, %arg7: memref<1x5xf32, #tpu.memory_space<vmem>>, %arg8: memref<8x4xf32, #tpu.memory_space<vmem>>) attributes {dimension_semantics = [#tpu.dimension_semantics<parallel>], iteration_bounds = array<i64: 1>, scalar_prefetch = 0 : i64, scratch_operands = 0 : i64, tpu.core_type = #tpu.core_type<tc>, window_params = [{transform_indices = @transform_0, window_bounds = array<i64: 8, 16>}, {pipeline_mode = #tpu.pipeline_mode<synchronous>, transform_indices = @transform_1, window_bounds = array<i64: 16, 32>}, {pipeline_mode = #tpu.pipeline_mode<synchronous>, transform_indices = @transform_2, window_bounds = array<i64: 1, 32>}, {pipeline_mode = #tpu.pipeline_mode<synchronous>, transform_indices = @transform_3, window_bounds = array<i64: 32, 32>}, {pipeline_mode = #tpu.pipeline_mode<synchronous>, transform_indices = @transform_4, window_bounds = array<i64: 1, 32>}, {pipeline_mode = #tpu.pipeline_mode<synchronous>, transform_indices = @transform_5, window_bounds = array<i64: 32, 5>}, {pipeline_mode = #tpu.pipeline_mode<synchronous>, transform_indices = @transform_6, window_bounds = array<i64: 1, 5>}, {transform_indices = @transform_7, window_bounds = array<i64: 8, 4>}]} {
    %c0 = arith.constant 0 : index
    %c0_0 = arith.constant 0 : index
    %0 = vector.load %arg1[%c0, %c0_0] : memref<8x16xf32, #tpu.memory_space<vmem>>, vector<8x16xf32>
    %c0_1 = arith.constant 0 : index
    %c0_2 = arith.constant 0 : index
    %1 = vector.load %arg2[%c0_1, %c0_2] : memref<16x32xf32, #tpu.memory_space<vmem>>, vector<16x32xf32>
    %cst = arith.constant dense<0.000000e+00> : vector<8x32xf32>
    %2 = tpu.matmul %0, %1, %cst {dimension_numbers = #tpu.dot_dimension_numbers<[1], [0], [0], [1], [0, 0, 1, 1], [], []>} : vector<8x16xf32>, vector<16x32xf32>, vector<8x32xf32> -> vector<8x32xf32>
    %c0_3 = arith.constant 0 : index
    %c0_4 = arith.constant 0 : index
    %3 = vector.load %arg3[%c0_3, %c0_4] : memref<1x32xf32, #tpu.memory_space<vmem>>, vector<1x32xf32>
    %4 = vector.broadcast %3 : vector<1x32xf32> to vector<8x32xf32>
    %5 = arith.addf %2, %4 : vector<8x32xf32>
    %cst_5 = arith.constant 0.000000e+00 : f32
    %6 = vector.broadcast %cst_5 : f32 to vector<8x32xf32>
    %7 = arith.maximumf %5, %6 : vector<8x32xf32>
    %c0_6 = arith.constant 0 : index
    %c0_7 = arith.constant 0 : index
    %8 = vector.load %arg4[%c0_6, %c0_7] : memref<32x32xf32, #tpu.memory_space<vmem>>, vector<32x32xf32>
    %cst_8 = arith.constant dense<0.000000e+00> : vector<8x32xf32>
    %9 = tpu.matmul %7, %8, %cst_8 {dimension_numbers = #tpu.dot_dimension_numbers<[1], [0], [0], [1], [0, 0, 1, 1], [], []>} : vector<8x32xf32>, vector<32x32xf32>, vector<8x32xf32> -> vector<8x32xf32>
    %c0_9 = arith.constant 0 : index
    %c0_10 = arith.constant 0 : index
    %10 = vector.load %arg5[%c0_9, %c0_10] : memref<1x32xf32, #tpu.memory_space<vmem>>, vector<1x32xf32>
    %11 = vector.broadcast %10 : vector<1x32xf32> to vector<8x32xf32>
    %12 = arith.addf %9, %11 : vector<8x32xf32>
    %cst_11 = arith.constant 0.000000e+00 : f32
    %13 = vector.broadcast %cst_11 : f32 to vector<8x32xf32>
    %14 = arith.maximumf %12, %13 : vector<8x32xf32>
    %c0_12 = arith.constant 0 : index
    %c0_13 = arith.constant 0 : index
    %15 = vector.load %arg6[%c0_12, %c0_13] : memref<32x5xf32, #tpu.memory_space<vmem>>, vector<32x5xf32>
    %cst_14 = arith.constant dense<0.000000e+00> : vector<8x5xf32>
    %16 = tpu.matmul %14, %15, %cst_14 {dimension_numbers = #tpu.dot_dimension_numbers<[1], [0], [0], [1], [0, 0, 1, 1], [], []>} : vector<8x32xf32>, vector<32x5xf32>, vector<8x5xf32> -> vector<8x5xf32>
    %c0_15 = arith.constant 0 : index
    %c0_16 = arith.constant 0 : index
    %17 = vector.load %arg7[%c0_15, %c0_16] : memref<1x5xf32, #tpu.memory_space<vmem>>, vector<1x5xf32>
    %18 = vector.broadcast %17 : vector<1x5xf32> to vector<8x5xf32>
    %19 = arith.addf %16, %18 : vector<8x5xf32>
    %20 = vector.extract_strided_slice %19 {offsets = [0, 0], sizes = [8, 1], strides = [1, 1]} : vector<8x5xf32> to vector<8x1xf32>
    %21 = vector.extract_strided_slice %19 {offsets = [0, 1], sizes = [8, 4], strides = [1, 1]} : vector<8x5xf32> to vector<8x4xf32>
    %cst_17 = arith.constant dense<0.000000e+00> : vector<8xf32>
    %22 = vector.multi_reduction <add>, %21, %cst_17 [1] : vector<8x4xf32> to vector<8xf32>
    %23 = vector.shape_cast %22 : vector<8xf32> to vector<8x1xf32>
    %cst_18 = arith.constant 2.500000e-01 : f32
    %24 = vector.broadcast %cst_18 : f32 to vector<8x1xf32>
    %25 = arith.mulf %23, %24 : vector<8x1xf32>
    %26 = vector.broadcast %25 : vector<8x1xf32> to vector<8x4xf32>
    %27 = arith.subf %21, %26 : vector<8x4xf32>
    %28 = vector.broadcast %20 : vector<8x1xf32> to vector<8x4xf32>
    %29 = arith.addf %28, %27 : vector<8x4xf32>
    %c0_19 = arith.constant 0 : index
    %c0_20 = arith.constant 0 : index
    %30 = vector.load %arg8[%c0_19, %c0_20] : memref<8x4xf32, #tpu.memory_space<vmem>>, vector<8x4xf32>
    tpu.vector_store %arg8[%c0_19, %c0_20], %29 {strides = array<i32>} : memref<8x4xf32, #tpu.memory_space<vmem>>, vector<8x4xf32>,
    return
  }
  func.func @transform_0(%arg0: i32) -> (i32, i32) {
    %c0_i32 = arith.constant 0 : i32
    %c0_i32_0 = arith.constant 0 : i32
    return %arg0, %c0_i32 : i32, i32
  }
  func.func @transform_1(%arg0: i32) -> (i32, i32) {
    %c0_i32 = arith.constant 0 : i32
    %c0_i32_0 = arith.constant 0 : i32
    %c0_i32_1 = arith.constant 0 : i32
    return %c0_i32, %c0_i32_0 : i32, i32
  }
  func.func @transform_2(%arg0: i32) -> (i32, i32) {
    %c0_i32 = arith.constant 0 : i32
    %c0_i32_0 = arith.constant 0 : i32
    %c0_i32_1 = arith.constant 0 : i32
    return %c0_i32, %c0_i32_0 : i32, i32
  }
  func.func @transform_3(%arg0: i32) -> (i32, i32) {
    %c0_i32 = arith.constant 0 : i32
    %c0_i32_0 = arith.constant 0 : i32
    %c0_i32_1 = arith.constant 0 : i32
    return %c0_i32, %c0_i32_0 : i32, i32
  }
  func.func @transform_4(%arg0: i32) -> (i32, i32) {
    %c0_i32 = arith.constant 0 : i32
    %c0_i32_0 = arith.constant 0 : i32
    %c0_i32_1 = arith.constant 0 : i32
    return %c0_i32, %c0_i32_0 : i32, i32
  }
  func.func @transform_5(%arg0: i32) -> (i32, i32) {
    %c0_i32 = arith.constant 0 : i32
    %c0_i32_0 = arith.constant 0 : i32
    %c0_i32_1 = arith.constant 0 : i32
    return %c0_i32, %c0_i32_0 : i32, i32
  }
  func.func @transform_6(%arg0: i32) -> (i32, i32) {
    %c0_i32 = arith.constant 0 : i32
    %c0_i32_0 = arith.constant 0 : i32
    %c0_i32_1 = arith.constant 0 : i32
    return %c0_i32, %c0_i32_0 : i32, i32
  }
  func.func @transform_7(%arg0: i32) -> (i32, i32) {
    %c0_i32 = arith.constant 0 : i32
    %c0_i32_0 = arith.constant 0 : i32
    return %arg0, %c0_i32 : i32, i32
  }
}

</mosaic_0001>

<bundles_post_ra>
// kernel: tpu_custom_call.1
= control target key start
LH: loop header
LB: loop body
LE: loop exit
PB: predicated region body
PF: predicated region fallthrough
CT: control target
= control target key end

     0   :  { %12 = vsyncpa [#allocation3], 0  ;;  %s202_s27 = smov [#allocation2]   ;;  %s203_s29 = smov 128   ;;  %s289_s0 = inlined_call_operand.vmem [shape: f32[8,16], index: 0, kind: input, shape index: {}]   ;;  %s290_s1 = inlined_call_operand.hbm [shape: f32[16,32], index: 1, kind: input, shape index: {}]   ;;  %s291_s2 = inlined_call_operand.vmem [shape: f32[1,32], index: 2, kind: input, shape index: {}]   ;;  %s292_s3 = inlined_call_operand.vmem [shape: f32[32,32], index: 3, kind: input, shape index: {}]   ;;  %s293_s4 = inlined_call_operand.vmem [shape: f32[1,32], index: 4, kind: input, shape index: {}]   ;;  %s294_s5 = inlined_call_operand.vmem [shape: f32[32,5], index: 5, kind: input, shape index: {}]   ;;  %s295_s6 = inlined_call_operand.vmem [shape: f32[1,5], index: 6, kind: input, shape index: {}]   ;;  %s296_s7 = inlined_call_operand.vmem [shape: f32[8,4], index: 7, kind: output, shape index: {}]  }
   0x1   :  { %s19_s26 = sshll.u32 %s290_s1, 4  ;;  %s21_s28 = sshll.u32 %s202_s27, 4  ;;  %s20_s26 = int_to_ptr.hbm [resolvable:$true] %s19_s26  ;;  %s22_s28 = int_to_ptr.vmem [resolvable:$true] %s21_s28 }
   0x2   :  { %s204_s30 = smov 8  }
   0x3   :  { %27 = dma.hbm_to_vmem [thread:$0]  %s20_s26, 256, %s22_s28, [#allocation3], %s203_s29, %s203_s29, %s204_s30  }
   0x4   :  { %200 = dma.done.wait [#allocation3], 256  }
   0x5   :  { %201 = vsyncadd [#allocation3], 4294967040  ;;  %v44_v0 = vld [vmem:[#allocation2 + $0x8] sm:$0xff]  ;;  %v43_v1 = vld [vmem:[#allocation2] sm:$0xff]  ;;  %vm49_vm0 = vcmask 130048   ;;  %vm82_vm1 = vcmask 261120  }
   0x6   :  { %67 = vmatpush.msra.mxu0 %v44_v0  ;;  %v42_v2 = vld [vmem:[%s289_s0] sm:$0xff]  ;;  %v77_v3 = vld [vmem:[%s292_s3 + $0x18] sm:$0xff]  ;;  %v76_v4 = vld [vmem:[%s292_s3 + $0x10] sm:$0xff]  ;;  %v205_v19 = vmov 0   ;;  %vm142_vm2 = vcmask 31744  }
   0x7   :  { %98 = vmatpush.msra.mxu1 %v77_v3  ;;  %v75_v5 = vld [vmem:[%s292_s3 + $0x8] sm:$0xff]  ;;  %v74_v6 = vld [vmem:[%s292_s3] sm:$0xff]  ;;  %v110_v7 = vld [vmem:[%s294_s5 + $0x18] sm:$0xff]  ;;  %171 = vset.pattern.permute.xlu1 %v205_v19 }
   0x8   :  { %68 = vmatpush.msra.mxu0 %v43_v1  ;;  %130 = vmatpush.msra.mxu2 %v110_v7  ;;  %v173_v8 = vld [vmem:[%s291_s2] ss:$0 sm:$0xff]  ;;  %v109_v12 = vld [vmem:[%s294_s5 + $0x10] sm:$0xff]  ;;  %v108_v13 = vld [vmem:[%s294_s5 + $0x8] sm:$0xff] }
   0x9   :  { %163 = vmatmul.msk.f32.vlgmr.msra.gmra.mxu0 %vm49_vm0, %v42_v2  ;;  %99 = vmatpush.msra.mxu1 %v76_v4  ;;  %v107_v14 = vld [vmem:[%s294_s5] sm:$0xff]  ;;  %s206_s5 = smov 127  }
   0xa   :  { %131 = vmatpush.msra.mxu2 %v109_v12  ;;  %v174_v15 = vld [vmem:[%s293_s4] ss:$0 sm:$0xff]  ;;  %172 = vset.pattern.permute.xlu0 %v205_v19 }
   0xb   :  { %100 = vmatpush.msra.mxu1 %v75_v5  ;;  %v175_v20 = vld [vmem:[%s295_s6] ss:$0 sm:$0xff] }
   0xc   :  { %132 = vmatpush.msra.mxu2 %v108_v13 }
   0xd   :  { %101 = vmatpush.msra.mxu1 %v74_v6 }
   0xe   :  { %133 = vmatpush.msra.mxu2 %v107_v14 }
  0x86   :  { %v70_v9 = vpop.f32.mrf.mxu0 }
  0x87   :  { %v71_v10 = vadd.f32 %v173_v8, %v70_v9 }
  0x89   :  { %v73_v11 = vmax.f32 %v71_v10, 0.0 }
  0x8b   :  { %164 = vmatmul.msk.f32.vlgmr.msra.gmra.mxu1 %vm82_vm1, %v73_v11 }
 0x108   :  { %v103_v16 = vpop.f32.mrf.mxu1 }
 0x109   :  { %v104_v17 = vadd.f32 %v174_v15, %v103_v16 }
 0x10b   :  { %v106_v18 = vmax.f32 %v104_v17, 0.0 }
 0x10d   :  { %165 = vmatmul.msk.f32.vlgmr.msra.gmra.mxu2 %vm82_vm1, %v106_v18 }
 0x190   :  { %v135_v21 = vpop.f32.mrf.mxu2 }
 0x191   :  { %v136_v22 = vadd.f32 %v175_v20, %v135_v21 }
 0x193   :  { %149 = vperm.xlu1 %171, %v136_v22   ;;  %139 = vrot.lane.b32.xlu0 %v136_v22, %s206_s5 }
 0x205   :  { %v140_v23 = vpop.permute.xlu0 %139  ;;  %v150_v28 = vpop.permute.xlu1 %149 }
 0x206   :  { %v143_v24 = vsel %vm142_vm2, %v140_v23, 0.0 }
 0x207   :  { %144 = vadd.xlane.f32.xlu0 %v143_v24 }
 0x27a   :  { %v145_v25 = vpop.xlane.xlu0 %144 }
 0x27b   :  { %v146_v26 = vmul.f32 0.25, %v145_v25 }
 0x27d   :  { %v147_v27 = vsub.f32 %v136_v22, %v146_v26 }
 0x27f   :  { %v152_v29 = vadd.f32 %v150_v28, %v147_v27 }
 0x281   :  { %154 = vrot.lane.b32.xlu1 %v152_v29, %s206_s5 }
 0x2f3   :  { %v155_v30 = vpop.permute.xlu1 %154 }
 0x2f4   :  { %157 = vst.msk [vmem:[%s296_s7] sm:$0xff] %vm142_vm2, %v155_v30 }
 0x2f5   :  { %162 = vsyncpa [#allocation3], 1 }

</bundles_post_ra>
